<compile_context>
chip_gen: v7x
topology: tpu7x:2x2x1
jax: 0.10.0
libtpu: 0.0.40
codegen_flags: <defaults>
</compile_context>

<pallas_src>
import functools

import jax
import jax.numpy as jnp
from jax.experimental import pallas as pl
from jax.experimental.pallas import tpu as pltpu


def _round_up(x: int, m: int) -> int:
    return (x + m - 1) // m * m


def _default_tanh_dtype():
    """bf16 tanh on chips with a bf16 EUP (v6e/v7x); f32 on older chips."""
    try:
        kind = jax.devices()[0].device_kind.lower()
    except Exception:
        return jnp.bfloat16
    for old in ("v2", "v3", "v4", "v5 lite", "v5e", "v5litepod"):
        if old in kind:
            return jnp.float32
    return jnp.bfloat16


# ----------------------------- Pallas kernel -------------------------------

def _actor_critic_kernel(
    obs_ref,                       # (tile_b, obs_dim)  weight dtype (bf16)
    w0_ref, b0_ref,                # (obs_dim, 2H) bf16, (1, 2H) f32
    w1_ref, b1_ref,                # (2H, 2H)      bf16, (1, 2H) f32
    w2_ref, b2_ref,                # (2H, 2H)      bf16, (1, 2H) f32
    wh_ref, bh_ref,                # (2H, head_n)  bf16, (1, head_n) f32
    out_ref,                       # (tile_b, head_n) f32 lane-dense slab
    *, tanh_dtype,
):
    wdt = w0_ref.dtype

    def layer(x, w_ref, b_ref):
        acc = jnp.dot(x, w_ref[...], preferred_element_type=jnp.float32) + b_ref[...]
        # tanh on the (cheaper) tanh_dtype; result goes straight to next MXU op.
        return jnp.tanh(acc.astype(tanh_dtype)).astype(wdt)

    h = layer(obs_ref[...], w0_ref, b0_ref)
    h = layer(h, w1_ref, b1_ref)
    h = layer(h, w2_ref, b2_ref)
    # Fused action + value head -> single lane-dense (tile_b, head_n) f32 store.
    out_ref[...] = (
        jnp.dot(h, wh_ref[...], preferred_element_type=jnp.float32) + bh_ref[...]
    )


# --------------------------- Parameter packing ------------------------------

def pack_params(params, weight_dtype=jnp.bfloat16):
    """Fuse pi/vf branches width-wise, pack both heads into one lane-dense
    (2H, 128) weight, cast weight matrices to `weight_dtype` (biases f32).

    Returns (packed_arrays_dict, act_dim) with act_dim as a plain Python int
    (keep it static; do NOT put it in a traced pytree)."""
    H = params["pi_w0"].shape[1]
    act_dim = int(params["action_w"].shape[1])
    head_n = _round_up(act_dim + 1, 128)   # lane-dense head width
    wdt = weight_dtype

    # Layer 0: [pi | vf] concat along output features.
    w0 = jnp.concatenate([params["pi_w0"], params["vf_w0"]], axis=1).astype(wdt)
    b0 = jnp.concatenate([params["pi_b0"], params["vf_b0"]], axis=1).astype(jnp.float32)

    # Layers 1, 2: block-diagonal so pi / vf latents never mix.
    def bdiag(a, b):
        z = jnp.zeros((H, H), jnp.float32)
        top = jnp.concatenate([a, z], axis=1)
        bot = jnp.concatenate([z, b], axis=1)
        return jnp.concatenate([top, bot], axis=0).astype(wdt)

    w1 = bdiag(params["pi_w1"], params["vf_w1"])
    b1 = jnp.concatenate([params["pi_b1"], params["vf_b1"]], axis=1).astype(jnp.float32)
    w2 = bdiag(params["pi_w2"], params["vf_w2"])
    b2 = jnp.concatenate([params["pi_b2"], params["vf_b2"]], axis=1).astype(jnp.float32)

    # Fused head: cols [0, act_dim) = action head (pi latent rows),
    #             col  act_dim      = value head  (vf latent rows), rest zero.
    wh = jnp.zeros((2 * H, head_n), jnp.float32)
    wh = wh.at[:H, :act_dim].set(params["action_w"])
    wh = wh.at[H:, act_dim].set(params["value_w"][:, 0])
    wh = wh.astype(wdt)

    bh = jnp.zeros((1, head_n), jnp.float32)
    bh = bh.at[0, :act_dim].set(params["action_b"][0])
    bh = bh.at[0, act_dim].set(params["value_b"][0, 0])

    packed = {
        "w0": w0, "b0": b0, "w1": w1, "b1": b1, "w2": w2, "b2": b2,
        "wh": wh, "bh": bh, "log_std": params["log_std"],
    }
    return packed, act_dim


# ------------------------------- Wrapper ------------------------------------

_MAX_TILE = 2048   # rows per batch tile at large B
_ALIGN = 16        # bf16 sublane-packed row alignment


def actor_critic_forward(obs, packed, act_dim, *, tanh_dtype=None):
    """Fused actor-critic forward pass in one Pallas call.

    `act_dim` must be a static Python int.  Returns (mean_actions, log_std,
    values) matching the PyTorch module.  Note: the wrapper slices mean/values
    out of the lane-dense slab; under jit these slices fuse with downstream
    consumers (no extra HBM pass)."""
    if tanh_dtype is None:
        tanh_dtype = _default_tanh_dtype()

    B, obs_dim = obs.shape
    head_n = packed["wh"].shape[1]
    H2 = packed["w1"].shape[0]           # 2 * hidden
    wdt = packed["w0"].dtype

    # Batch tiling: single small tile for tiny B; otherwise >= 2 parallel tiles
    # (keeps v7x's second TensorCore busy) of up to _MAX_TILE rows each
    # (amortizes the ~0.35 us per-grid-step pipeline overhead).
    if B <= 128:
        num_tiles = 1
        tile_b = _round_up(B, _ALIGN)
    else:
        num_tiles = max(2, pl.cdiv(B, _MAX_TILE))
        tile_b = min(_MAX_TILE, _round_up(pl.cdiv(B, num_tiles), _ALIGN))
    padded_b = tile_b * num_tiles

    # Cast obs to the weight dtype in the wrapper (halves obs DMA for bf16).
    obs_c = obs.astype(wdt)
    if padded_b != B:
        obs_p = jnp.zeros((padded_b, obs_dim), wdt).at[:B].set(obs_c)
    else:
        obs_p = obs_c

    weight_args = [
        packed["w0"], packed["b0"],
        packed["w1"], packed["b1"],
        packed["w2"], packed["b2"],
        packed["wh"], packed["bh"],
    ]

    # Weights / biases: batch-invariant index_map -> stay resident in VMEM.
    def resident_spec(a):
        nd = a.ndim
        return pl.BlockSpec(a.shape, lambda i, _n=nd: (0,) * _n)

    flops = 2 * padded_b * (obs_dim * H2 + 2 * H2 * H2 + H2 * head_n)
    transcendentals = 3 * padded_b * H2          # 3 fused tanh layers of width 2H
    bytes_accessed = (
        obs_p.size * obs_p.dtype.itemsize
        + sum(int(a.size) * a.dtype.itemsize for a in weight_args)
        + padded_b * head_n * 4
    )

    kernel = functools.partial(_actor_critic_kernel, tanh_dtype=tanh_dtype)

    out = pl.pallas_call(
        kernel,
        out_shape=jax.ShapeDtypeStruct((padded_b, head_n), jnp.float32),
        grid=(num_tiles,),
        in_specs=[pl.BlockSpec((tile_b, obs_dim), lambda i: (i, 0))]
                 + [resident_spec(a) for a in weight_args],
        out_specs=pl.BlockSpec((tile_b, head_n), lambda i: (i, 0)),
        compiler_params=pltpu.CompilerParams(
            dimension_semantics=("parallel",)),
        cost_estimate=pl.CostEstimate(
            flops=flops,
            transcendentals=transcendentals,
            bytes_accessed=bytes_accessed),
    )(obs_p, *weight_args)

    mean = out[:B, :act_dim]
    values = out[:B, act_dim:act_dim + 1]
    return mean, packed["log_std"], values


# --------------------------- Parameter creation ------------------------------

def make_params(key, obs_dim, act_dim, hidden, log_std_init=-2.0):
    """Orthogonal init mirroring the PyTorch _init_weights():
    MLP layers gain sqrt(2), action head gain 0.01, value head gain 1.0,
    zero biases, log_std constant log_std_init.  Weights stored (in, out)."""
    keys = jax.random.split(key, 8)

    def ortho(k, shape, gain):
        return jax.nn.initializers.orthogonal(scale=gain)(k, shape, jnp.float32)

    g = jnp.sqrt(2.0)
    return {
        "pi_w0": ortho(keys[0], (obs_dim, hidden), g),
        "pi_b0": jnp.zeros((1, hidden), jnp.float32),
        "pi_w1": ortho(keys[1], (hidden, hidden), g),
        "pi_b1": jnp.zeros((1, hidden), jnp.float32),
        "pi_w2": ortho(keys[2], (hidden, hidden), g),
        "pi_b2": jnp.zeros((1, hidden), jnp.float32),
        "vf_w0": ortho(keys[3], (obs_dim, hidden), g),
        "vf_b0": jnp.zeros((1, hidden), jnp.float32),
        "vf_w1": ortho(keys[4], (hidden, hidden), g),
        "vf_b1": jnp.zeros((1, hidden), jnp.float32),
        "vf_w2": ortho(keys[5], (hidden, hidden), g),
        "vf_b2": jnp.zeros((1, hidden), jnp.float32),
        "action_w": ortho(keys[6], (hidden, act_dim), 0.01),
        "action_b": jnp.zeros((1, act_dim), jnp.float32),
        "value_w": ortho(keys[7], (hidden, 1), 1.0),
        "value_b": jnp.zeros((1, 1), jnp.float32),
        "log_std": jnp.full((act_dim,), log_std_init, jnp.float32),
    }


# ------------------------------ References -----------------------------------

def reference_forward_packed(obs, packed, act_dim, tanh_dtype):
    """Pure-JAX reference with exactly the same fused / low-precision math as
    the kernel."""
    wdt = packed["w0"].dtype

    def layer(x, w, b):
        acc = jnp.dot(x, w, preferred_element_type=jnp.float32) + b
        return jnp.tanh(acc.astype(tanh_dtype)).astype(wdt)

    h = layer(obs.astype(wdt), packed["w0"], packed["b0"])
    h = layer(h, packed["w1"], packed["b1"])
    h = layer(h, packed["w2"], packed["b2"])
    out = jnp.dot(h, packed["wh"], preferred_element_type=jnp.float32) + packed["bh"]
    return out[:, :act_dim], out[:, act_dim:act_dim + 1]


def reference_forward_f32(obs, p):
    """Pure-f32 reference matching the original PyTorch module exactly."""
    def mlp(x, w0, b0, w1, b1, w2, b2):
        h = jnp.tanh(x @ w0 + b0)
        h = jnp.tanh(h @ w1 + b1)
        h = jnp.tanh(h @ w2 + b2)
        return h

    lp = mlp(obs, p["pi_w0"], p["pi_b0"], p["pi_w1"], p["pi_b1"], p["pi_w2"], p["pi_b2"])
    lv = mlp(obs, p["vf_w0"], p["vf_b0"], p["vf_w1"], p["vf_b1"], p["vf_w2"], p["vf_b2"])
    mean = lp @ p["action_w"] + p["action_b"]
    values = lv @ p["value_w"] + p["value_b"]
    return mean, p["log_std"], values


# TODO(synk): DiagGaussianDistribution sampling / log_prob / entropy (used by
# predict / evaluate_actions) are distribution utilities outside forward() and
# are not implemented as Pallas kernels here.

if __name__ == "__main__":
    # Small, tile-friendly shapes consistent with the module's forward.
    B, OBS_DIM, ACT_DIM, HIDDEN = 8, 32, 8, 128

    key = jax.random.PRNGKey(0)
    k_obs, k_par = jax.random.split(key)
    obs = jax.random.normal(k_obs, (B, OBS_DIM), dtype=jnp.float32)
    params = make_params(k_par, OBS_DIM, ACT_DIM, HIDDEN, log_std_init=-2.0)
    packed, act_dim = pack_params(params)

    tanh_dtype = _default_tanh_dtype()
    mean, log_std, values = actor_critic_forward(
        obs, packed, act_dim, tanh_dtype=tanh_dtype)
    jax.block_until_ready((mean, log_std, values))

    # Shape checks (same contract as the PyTorch module).
    assert mean.shape == (B, ACT_DIM)
    assert log_std.shape == (ACT_DIM,)
    assert values.shape == (B, 1)

    # Tight check against a pure-JAX reference with identical fused/bf16 math.
    ref_mean_p, ref_vals_p = reference_forward_packed(obs, packed, act_dim, tanh_dtype)
    assert jnp.allclose(mean, ref_mean_p, atol=2e-3, rtol=2e-3)
    assert jnp.allclose(values, ref_vals_p, atol=2e-3, rtol=2e-3)

    # Loose sanity check against the original full-f32 semantics.
    ref_mean_f32, ref_log_std, ref_vals_f32 = reference_forward_f32(obs, params)
    assert jnp.allclose(mean, ref_mean_f32, atol=5e-2)
    assert jnp.allclose(values, ref_vals_f32, atol=2e-1)
    assert jnp.allclose(log_std, ref_log_std)

    print("KERNEL_OK")
</pallas_src>

<mosaic_0001>
module attributes {stable_mosaic.version = 11 : i64} {
  func.func @_actor_critic_kernel(%arg0: i32, %arg1: memref<16x32xbf16, #tpu.memory_space<vmem>>, %arg2: memref<32x256xbf16, #tpu.memory_space<vmem>>, %arg3: memref<1x256xf32, #tpu.memory_space<vmem>>, %arg4: memref<256x256xbf16, #tpu.memory_space<vmem>>, %arg5: memref<1x256xf32, #tpu.memory_space<vmem>>, %arg6: memref<256x256xbf16, #tpu.memory_space<vmem>>, %arg7: memref<1x256xf32, #tpu.memory_space<vmem>>, %arg8: memref<256x128xbf16, #tpu.memory_space<vmem>>, %arg9: memref<1x128xf32, #tpu.memory_space<vmem>>, %arg10: memref<16x128xf32, #tpu.memory_space<vmem>>) attributes {dimension_semantics = [#tpu.dimension_semantics<parallel>], iteration_bounds = array<i64: 1>, scalar_prefetch = 0 : i64, scratch_operands = 0 : i64, tpu.core_type = #tpu.core_type<tc>, window_params = [{transform_indices = @transform_0, window_bounds = array<i64: 16, 32>}, {pipeline_mode = #tpu.pipeline_mode<synchronous>, transform_indices = @transform_1, window_bounds = array<i64: 32, 256>}, {pipeline_mode = #tpu.pipeline_mode<synchronous>, transform_indices = @transform_2, window_bounds = array<i64: 1, 256>}, {pipeline_mode = #tpu.pipeline_mode<synchronous>, transform_indices = @transform_3, window_bounds = array<i64: 256, 256>}, {pipeline_mode = #tpu.pipeline_mode<synchronous>, transform_indices = @transform_4, window_bounds = array<i64: 1, 256>}, {pipeline_mode = #tpu.pipeline_mode<synchronous>, transform_indices = @transform_5, window_bounds = array<i64: 256, 256>}, {pipeline_mode = #tpu.pipeline_mode<synchronous>, transform_indices = @transform_6, window_bounds = array<i64: 1, 256>}, {pipeline_mode = #tpu.pipeline_mode<synchronous>, transform_indices = @transform_7, window_bounds = array<i64: 256, 128>}, {pipeline_mode = #tpu.pipeline_mode<synchronous>, transform_indices = @transform_8, window_bounds = array<i64: 1, 128>}, {transform_indices = @transform_9, window_bounds = array<i64: 16, 128>}]} {
    %c0 = arith.constant 0 : index
    %c0_0 = arith.constant 0 : index
    %0 = vector.load %arg1[%c0, %c0_0] : memref<16x32xbf16, #tpu.memory_space<vmem>>, vector<16x32xbf16>
    %c0_1 = arith.constant 0 : index
    %c0_2 = arith.constant 0 : index
    %1 = vector.load %arg2[%c0_1, %c0_2] : memref<32x256xbf16, #tpu.memory_space<vmem>>, vector<32x256xbf16>
    %cst = arith.constant dense<0.000000e+00> : vector<16x256xf32>
    %2 = tpu.matmul %0, %1, %cst {dimension_numbers = #tpu.dot_dimension_numbers<[1], [0], [0], [1], [0, 0, 1, 1], [], []>} : vector<16x32xbf16>, vector<32x256xbf16>, vector<16x256xf32> -> vector<16x256xf32>
    %c0_3 = arith.constant 0 : index
    %c0_4 = arith.constant 0 : index
    %3 = vector.load %arg3[%c0_3, %c0_4] : memref<1x256xf32, #tpu.memory_space<vmem>>, vector<1x256xf32>
    %4 = vector.broadcast %3 : vector<1x256xf32> to vector<16x256xf32>
    %5 = arith.addf %2, %4 : vector<16x256xf32>
    %6 = arith.truncf %5 : vector<16x256xf32> to vector<16x256xbf16>
    %7 = math.tanh %6 : vector<16x256xbf16>
    %c0_5 = arith.constant 0 : index
    %c0_6 = arith.constant 0 : index
    %8 = vector.load %arg4[%c0_5, %c0_6] : memref<256x256xbf16, #tpu.memory_space<vmem>>, vector<256x256xbf16>
    %cst_7 = arith.constant dense<0.000000e+00> : vector<16x256xf32>
    %9 = tpu.matmul %7, %8, %cst_7 {dimension_numbers = #tpu.dot_dimension_numbers<[1], [0], [0], [1], [0, 0, 1, 1], [], []>} : vector<16x256xbf16>, vector<256x256xbf16>, vector<16x256xf32> -> vector<16x256xf32>
    %c0_8 = arith.constant 0 : index
    %c0_9 = arith.constant 0 : index
    %10 = vector.load %arg5[%c0_8, %c0_9] : memref<1x256xf32, #tpu.memory_space<vmem>>, vector<1x256xf32>
    %11 = vector.broadcast %10 : vector<1x256xf32> to vector<16x256xf32>
    %12 = arith.addf %9, %11 : vector<16x256xf32>
    %13 = arith.truncf %12 : vector<16x256xf32> to vector<16x256xbf16>
    %14 = math.tanh %13 : vector<16x256xbf16>
    %c0_10 = arith.constant 0 : index
    %c0_11 = arith.constant 0 : index
    %15 = vector.load %arg6[%c0_10, %c0_11] : memref<256x256xbf16, #tpu.memory_space<vmem>>, vector<256x256xbf16>
    %cst_12 = arith.constant dense<0.000000e+00> : vector<16x256xf32>
    %16 = tpu.matmul %14, %15, %cst_12 {dimension_numbers = #tpu.dot_dimension_numbers<[1], [0], [0], [1], [0, 0, 1, 1], [], []>} : vector<16x256xbf16>, vector<256x256xbf16>, vector<16x256xf32> -> vector<16x256xf32>
    %c0_13 = arith.constant 0 : index
    %c0_14 = arith.constant 0 : index
    %17 = vector.load %arg7[%c0_13, %c0_14] : memref<1x256xf32, #tpu.memory_space<vmem>>, vector<1x256xf32>
    %18 = vector.broadcast %17 : vector<1x256xf32> to vector<16x256xf32>
    %19 = arith.addf %16, %18 : vector<16x256xf32>
    %20 = arith.truncf %19 : vector<16x256xf32> to vector<16x256xbf16>
    %21 = math.tanh %20 : vector<16x256xbf16>
    %c0_15 = arith.constant 0 : index
    %c0_16 = arith.constant 0 : index
    %22 = vector.load %arg8[%c0_15, %c0_16] : memref<256x128xbf16, #tpu.memory_space<vmem>>, vector<256x128xbf16>
    %cst_17 = arith.constant dense<0.000000e+00> : vector<16x128xf32>
    %23 = tpu.matmul %21, %22, %cst_17 {dimension_numbers = #tpu.dot_dimension_numbers<[1], [0], [0], [1], [0, 0, 1, 1], [], []>} : vector<16x256xbf16>, vector<256x128xbf16>, vector<16x128xf32> -> vector<16x128xf32>
    %c0_18 = arith.constant 0 : index
    %c0_19 = arith.constant 0 : index
    %24 = vector.load %arg9[%c0_18, %c0_19] : memref<1x128xf32, #tpu.memory_space<vmem>>, vector<1x128xf32>
    %25 = vector.broadcast %24 : vector<1x128xf32> to vector<16x128xf32>
    %26 = arith.addf %23, %25 : vector<16x128xf32>
    %c0_20 = arith.constant 0 : index
    %c0_21 = arith.constant 0 : index
    %27 = vector.load %arg10[%c0_20, %c0_21] : memref<16x128xf32, #tpu.memory_space<vmem>>, vector<16x128xf32>
    tpu.vector_store %arg10[%c0_20, %c0_21], %26 {strides = array<i32>} : memref<16x128xf32, #tpu.memory_space<vmem>>, vector<16x128xf32>,
    return
  }
  func.func @transform_0(%arg0: i32) -> (i32, i32) {
    %c0_i32 = arith.constant 0 : i32
    %c0_i32_0 = arith.constant 0 : i32
    return %arg0, %c0_i32 : i32, i32
  }
  func.func @transform_1(%arg0: i32) -> (i32, i32) {
    %c0_i32 = arith.constant 0 : i32
    %c0_i32_0 = arith.constant 0 : i32
    %c0_i32_1 = arith.constant 0 : i32
    return %c0_i32, %c0_i32_0 : i32, i32
  }
  func.func @transform_2(%arg0: i32) -> (i32, i32) {
    %c0_i32 = arith.constant 0 : i32
    %c0_i32_0 = arith.constant 0 : i32
    %c0_i32_1 = arith.constant 0 : i32
    return %c0_i32, %c0_i32_0 : i32, i32
  }
  func.func @transform_3(%arg0: i32) -> (i32, i32) {
    %c0_i32 = arith.constant 0 : i32
    %c0_i32_0 = arith.constant 0 : i32
    %c0_i32_1 = arith.constant 0 : i32
    return %c0_i32, %c0_i32_0 : i32, i32
  }
  func.func @transform_4(%arg0: i32) -> (i32, i32) {
    %c0_i32 = arith.constant 0 : i32
    %c0_i32_0 = arith.constant 0 : i32
    %c0_i32_1 = arith.constant 0 : i32
    return %c0_i32, %c0_i32_0 : i32, i32
  }
  func.func @transform_5(%arg0: i32) -> (i32, i32) {
    %c0_i32 = arith.constant 0 : i32
    %c0_i32_0 = arith.constant 0 : i32
    %c0_i32_1 = arith.constant 0 : i32
    return %c0_i32, %c0_i32_0 : i32, i32
  }
  func.func @transform_6(%arg0: i32) -> (i32, i32) {
    %c0_i32 = arith.constant 0 : i32
    %c0_i32_0 = arith.constant 0 : i32
    %c0_i32_1 = arith.constant 0 : i32
    return %c0_i32, %c0_i32_0 : i32, i32
  }
  func.func @transform_7(%arg0: i32) -> (i32, i32) {
    %c0_i32 = arith.constant 0 : i32
    %c0_i32_0 = arith.constant 0 : i32
    %c0_i32_1 = arith.constant 0 : i32
    return %c0_i32, %c0_i32_0 : i32, i32
  }
  func.func @transform_8(%arg0: i32) -> (i32, i32) {
    %c0_i32 = arith.constant 0 : i32
    %c0_i32_0 = arith.constant 0 : i32
    %c0_i32_1 = arith.constant 0 : i32
    return %c0_i32, %c0_i32_0 : i32, i32
  }
  func.func @transform_9(%arg0: i32) -> (i32, i32) {
    %c0_i32 = arith.constant 0 : i32
    %c0_i32_0 = arith.constant 0 : i32
    return %arg0, %c0_i32 : i32, i32
  }
}

</mosaic_0001>

<bundles_post_ra>
// kernel: tpu_custom_call.1
= control target key start
LH: loop header
LB: loop body
LE: loop exit
PB: predicated region body
PF: predicated region fallthrough
CT: control target
= control target key end

     0   :  { %14 = vsyncpa [#allocation3], 0  ;;  %s1459_s0 = inlined_call_operand.hbm [shape: bf16[16,32], index: 0, kind: input, shape index: {}]   ;;  %s1460_s1 = inlined_call_operand.hbm [shape: bf16[32,256], index: 1, kind: input, shape index: {}]   ;;  %s1461_s2 = inlined_call_operand.vmem [shape: f32[1,256], index: 2, kind: input, shape index: {}]   ;;  %s1462_s3 = inlined_call_operand.hbm [shape: bf16[256,256], index: 3, kind: input, shape index: {}]   ;;  %s1463_s4 = inlined_call_operand.vmem [shape: f32[1,256], index: 4, kind: input, shape index: {}]   ;;  %s1464_s5 = inlined_call_operand.hbm [shape: bf16[256,256], index: 5, kind: input, shape index: {}]   ;;  %s1465_s6 = inlined_call_operand.vmem [shape: f32[1,256], index: 6, kind: input, shape index: {}]   ;;  %s1466_s7 = inlined_call_operand.hbm [shape: bf16[256,128], index: 7, kind: input, shape index: {}]   ;;  %s1467_s8 = inlined_call_operand.vmem [shape: f32[1,128], index: 8, kind: input, shape index: {}]   ;;  %s1468_s9 = inlined_call_operand.hbm [shape: f32[16,128], index: 9, kind: output, shape index: {}]  }
   0x1   :  { %15 = vsyncpa [#allocation6], 0 }
   0x2   :  { %16 = vsyncpa [#allocation9], 0 }
   0x3   :  { %17 = vsyncpa [#allocation4], 0  ;;  %s1286_s30 = smov [#allocation5]   ;;  %s1146_s13 = scalar_lea.hbm %s1460_s1, 512 }
   0x4   :  { %s35_s10 = sshll.u32 %s1286_s30, 4  ;;  %p1147_p0 = scmp.ne.s32.totalorder %s1460_s1, %s1146_s13  ;;  %s36_s10 = int_to_ptr.vmem [resolvable:$true] %s35_s10 }
   0x5   :  { %p1150_p1 = scmp.lt.u32.totalorder %s1146_s13, %s1460_s1 }
   0x7   :  { %p1152_p2 = pnand %p1150_p1, %p1147_p0 }
   0x9   :  { %1155 = shalt.err (!%p1152_p2)
}
   0xa   :  { %s1156_s18 = scalar_lea.vmem %s36_s10, 512  ;;  %p1161_p4 = scmp.lt.s32.totalorder %s36_s10, %s36_s10 }
   0xb   :  { %p1157_p3 = scmp.ne.s32.totalorder %s36_s10, %s1156_s18  ;;  %p1162_p5 = scmp.lt.s32.totalorder %s1156_s18, %s1156_s18 }
   0xd   :  { %p1163_p6 = por %p1162_p5, %p1161_p4 }
   0xf   :  { %p1164_p7 = pnand %p1163_p6, %p1157_p3 }
  0x11   :  { %1167 = shalt.err (!%p1164_p7)
}
  0x12   :  { %s1287_s19 = smov 128   ;;  %s1288_s20 = smov 8  }
  0x13   :  { %41 = dma.hbm_to_vmem [thread:$0]  %s1460_s1, 512, %s36_s10, [#allocation6], %s1287_s19, %s1287_s19, %s1288_s20  }
  0x14   :  { %s1289_s23 = smov [#allocation8]   ;;  %s1290_s25 = smov [#allocation2]  }
  0x15   :  { %s63_s24 = sshll.u32 %s1289_s23, 4  ;;  %s23_s26 = sshll.u32 %s1290_s25, 4  ;;  %s64_s24 = int_to_ptr.vmem [resolvable:$true] %s63_s24  ;;  %s24_s26 = int_to_ptr.vmem [resolvable:$true] %s23_s26 }
  0x16   :  { %s1168_s29 = scalar_lea.hbm %s1464_s5, 4096 }
  0x17   :  { %p1169_p8 = scmp.ne.s32.totalorder %s1464_s5, %s1168_s29  ;;  %p1172_p9 = scmp.lt.u32.totalorder %s1168_s29, %s1464_s5 }
  0x19   :  { %p1174_p10 = pnand %p1172_p9, %p1169_p8 }
  0x1b   :  { %1177 = shalt.err (!%p1174_p10)
}
  0x1c   :  { %s1178_s1 = scalar_lea.vmem %s64_s24, 4096  ;;  %p1183_p12 = scmp.lt.s32.totalorder %s64_s24, %s64_s24 }
  0x1d   :  { %p1179_p11 = scmp.ne.s32.totalorder %s64_s24, %s1178_s1  ;;  %p1184_p13 = scmp.lt.s32.totalorder %s1178_s1, %s1178_s1 }
  0x1f   :  { %p1185_p0 = por %p1184_p13, %p1183_p12 }
  0x21   :  { %p1186_p1 = pnand %p1185_p0, %p1179_p11 }
  0x23   :  { %1189 = shalt.err (!%p1186_p1)
}
  0x24   :  { %69 = dma.hbm_to_vmem [thread:$0]  %s1464_s5, 4096, %s64_s24, [#allocation9], %s1287_s19, %s1287_s19, %s1288_s20  }
  0x25   :  { %s1190_s17 = scalar_lea.hbm %s1459_s0, 128 }
  0x26   :  { %p1191_p2 = scmp.ne.s32.totalorder %s1459_s0, %s1190_s17  ;;  %p1194_p3 = scmp.lt.u32.totalorder %s1190_s17, %s1459_s0 }
  0x28   :  { %p1196_p4 = pnand %p1194_p3, %p1191_p2 }
  0x2a   :  { %1199 = shalt.err (!%p1196_p4)
}
  0x2b   :  { %s1200_s25 = scalar_lea.vmem %s24_s26, 128  ;;  %p1205_p6 = scmp.lt.s32.totalorder %s24_s26, %s24_s26 }
  0x2c   :  { %p1201_p5 = scmp.ne.s32.totalorder %s24_s26, %s1200_s25  ;;  %p1206_p7 = scmp.lt.s32.totalorder %s1200_s25, %s1200_s25 }
  0x2e   :  { %p1207_p8 = por %p1206_p7, %p1205_p6 }
  0x30   :  { %p1208_p9 = pnand %p1207_p8, %p1201_p5 }
  0x32   :  { %1211 = shalt.err (!%p1208_p9)
}
  0x33   :  { %s1291_s5 = smov 64   ;;  %s1292_s24 = smov 4  }
  0x34   :  { %29 = dma.hbm_to_vmem [thread:$0]  %s1459_s0, 128, %s24_s26, [#allocation3], %s1291_s5, %s1291_s5, %s1292_s24  }
  0x35   :  { %s1293_s29 = smov [#allocation7]   ;;  %s1294_s11 = smov [#allocation10]  }
  0x36   :  { %s49_s30 = sshll.u32 %s1293_s29, 4  ;;  %s77_s12 = sshll.u32 %s1294_s11, 4  ;;  %s50_s30 = int_to_ptr.vmem [resolvable:$true] %s49_s30  ;;  %s78_s12 = int_to_ptr.vmem [resolvable:$true] %s77_s12 }
  0x37   :  { %s1212_s10 = scalar_lea.hbm %s1462_s3, 4096 }
  0x38   :  { %p1213_p10 = scmp.ne.s32.totalorder %s1462_s3, %s1212_s10  ;;  %p1216_p11 = scmp.lt.u32.totalorder %s1212_s10, %s1462_s3 }
  0x3a   :  { %p1218_p12 = pnand %p1216_p11, %p1213_p10 }
  0x3c   :  { %1221 = shalt.err (!%p1218_p12)
}
  0x3d   :  { %s1222_s0 = scalar_lea.vmem %s50_s30, 4096  ;;  %p1227_p0 = scmp.lt.s32.totalorder %s50_s30, %s50_s30 }
  0x3e   :  { %p1223_p13 = scmp.ne.s32.totalorder %s50_s30, %s1222_s0  ;;  %p1228_p1 = scmp.lt.s32.totalorder %s1222_s0, %s1222_s0 }
  0x40   :  { %p1229_p2 = por %p1228_p1, %p1227_p0 }
  0x42   :  { %p1230_p3 = pnand %p1229_p2, %p1223_p13 }
  0x44   :  { %1233 = shalt.err (!%p1230_p3)
}
  0x45   :  { %55 = dma.hbm_to_vmem [thread:$0]  %s1462_s3, 4096, %s50_s30, [#allocation6], %s1287_s19, %s1287_s19, %s1288_s20  }
  0x46   :  { %s1234_s23 = scalar_lea.hbm %s1466_s7, 2048 }
  0x47   :  { %p1235_p4 = scmp.ne.s32.totalorder %s1466_s7, %s1234_s23  ;;  %p1238_p5 = scmp.lt.u32.totalorder %s1234_s23, %s1466_s7 }
  0x49   :  { %p1240_p6 = pnand %p1238_p5, %p1235_p4 }
  0x4b   :  { %1243 = shalt.err (!%p1240_p6)
}
  0x4c   :  { %s1244_s11 = scalar_lea.vmem %s78_s12, 2048  ;;  %p1249_p8 = scmp.lt.s32.totalorder %s78_s12, %s78_s12 }
  0x4d   :  { %p1245_p7 = scmp.ne.s32.totalorder %s78_s12, %s1244_s11  ;;  %p1250_p9 = scmp.lt.s32.totalorder %s1244_s11, %s1244_s11 }
  0x4f   :  { %p1251_p10 = por %p1250_p9, %p1249_p8 }
  0x51   :  { %p1252_p11 = pnand %p1251_p10, %p1245_p7 }
  0x53   :  { %1255 = shalt.err (!%p1252_p11)
}
  0x54   :  { %83 = dma.hbm_to_vmem [thread:$0]  %s1466_s7, 2048, %s78_s12, [#allocation9], %s1291_s5, %s1291_s5, %s1292_s24  }
  0x55   :  { %1278 = dma.done.wait [#allocation3], 128  }
  0x56   :  { %1279 = vsyncadd [#allocation3], 4294967168 }
  0x57   :  { %1280 = dma.done.wait [#allocation6], 4608  }
  0x58   :  { %1281 = vsyncadd [#allocation6], 4294962688 }
  0x59   :  { %1282 = dma.done.wait [#allocation9], 6144  }
  0x5a   :  { %1283 = vsyncadd [#allocation9], 4294961152  ;;  %v1295_v0 = vmov 0   ;;  %v1015_v1 = vld [vmem:[#allocation5 + $0x4] ss:$8 sps:$4 sm:$0xff]   ;;  %v1021_v8 = vld [vmem:[#allocation2] sm:$0xff]   ;;  %v110_v60 = vlaneseq }
  0x5b   :  { %181 = vmatprep.mubr.bf16.mxu0 %v1295_v0  ;;  %v1017_v2 = vld [vmem:[#allocation5] ss:$8 sps:$4 sm:$0xff]   ;;  %149 = vmatprep.subr.bf16.mxu0 %v1015_v1  ;;  %v1018_v3 = vld [vmem:[#allocation5 + $0x14] ss:$8 sps:$4 sm:$0xff]   ;;  %v1020_v4 = vld [vmem:[#allocation5 + $0x10] ss:$8 sps:$4 sm:$0xff]  }
  0x5c   :  { %150 = vmatpush1.bf16.msra.mxu0 %v1017_v2  ;;  %v1022_v5 = vld [vmem:[#allocation7 + $0x4] ss:$8 sps:$4 sm:$0xff]   ;;  %v1024_v6 = vld [vmem:[#allocation7] ss:$8 sps:$4 sm:$0xff]   ;;  %v1025_v7 = vld [vmem:[#allocation7 + $0x14] ss:$8 sps:$4 sm:$0xff]  }
  0x5d   :  { %151 = vmatprep.subr.bf16.mxu0 %v1018_v3  ;;  %400 = vmatprep.subr.bf16.mxu1 %v1022_v5  ;;  %vm145_vm0 = vcmask 261120   ;;  %v1027_v9 = vld [vmem:[#allocation7 + $0x10] ss:$8 sps:$4 sm:$0xff]   ;;  %v1028_v10 = vld [vmem:[#allocation7 + $0x24] ss:$8 sps:$4 sm:$0xff]   ;;  %v111_v61 = vshrl.u32 %v110_v60, 7 }
  0x5e   :  { %401 = vmatpush1.bf16.msra.mxu1 %v1024_v6  ;;  %v1030_v11 = vld [vmem:[#allocation7 + $0x20] ss:$8 sps:$4 sm:$0xff]   ;;  %v1031_v12 = vld [vmem:[#allocation7 + $0x34] ss:$8 sps:$4 sm:$0xff]   ;;  %v1033_v13 = vld [vmem:[#allocation7 + $0x30] ss:$8 sps:$4 sm:$0xff]  }
  0x5f   :  { %402 = vmatprep.subr.bf16.mxu1 %v1025_v7  ;;  %v1034_v14 = vld [vmem:[#allocation7 + $0x44] ss:$8 sps:$4 sm:$0xff]   ;;  %v1036_v15 = vld [vmem:[#allocation7 + $0x40] ss:$8 sps:$4 sm:$0xff]   ;;  %v1037_v16 = vld [vmem:[#allocation7 + $0x54] ss:$8 sps:$4 sm:$0xff]  }
  0x60   :  { %152 = vmatpush1.bf16.msra.mxu0 %v1020_v4  ;;  %v1039_v17 = vld [vmem:[#allocation7 + $0x50] ss:$8 sps:$4 sm:$0xff]   ;;  %v1040_v18 = vld [vmem:[#allocation7 + $0x64] ss:$8 sps:$4 sm:$0xff]   ;;  %v1042_v19 = vld [vmem:[#allocation7 + $0x60] ss:$8 sps:$4 sm:$0xff]  }
  0x61   :  { %v1043_v20 = vld [vmem:[#allocation7 + $0x74] ss:$8 sps:$4 sm:$0xff]   ;;  %v1045_v21 = vld [vmem:[#allocation7 + $0x70] ss:$8 sps:$4 sm:$0xff]   ;;  %v1046_v22 = vld [vmem:[#allocation7 + $0x84] ss:$8 sps:$4 sm:$0xff]  }
  0x62   :  { %403 = vmatpush1.bf16.msra.mxu1 %v1027_v9  ;;  %v1048_v23 = vld [vmem:[#allocation7 + $0x80] ss:$8 sps:$4 sm:$0xff]   ;;  %v1049_v24 = vld [vmem:[#allocation7 + $0x94] ss:$8 sps:$4 sm:$0xff]   ;;  %v1051_v25 = vld [vmem:[#allocation7 + $0x90] ss:$8 sps:$4 sm:$0xff]  }
  0x63   :  { %900 = vmatmul.mubr.msk.bf16.vlgmr.msra.gmra.mrb[0].mxu0 %vm145_vm0, %v1021_v8  ;;  %404 = vmatprep.subr.bf16.mxu1 %v1028_v10  ;;  %v1052_v26 = vld [vmem:[#allocation7 + $0xa4] ss:$8 sps:$4 sm:$0xff]   ;;  %v1054_v27 = vld [vmem:[#allocation7 + $0xa0] ss:$8 sps:$4 sm:$0xff]   ;;  %v1055_v28 = vld [vmem:[#allocation7 + $0xb4] ss:$8 sps:$4 sm:$0xff]  }
  0x64   :  { %v1057_v29 = vld [vmem:[#allocation7 + $0xb0] ss:$8 sps:$4 sm:$0xff]   ;;  %v1058_v30 = vld [vmem:[#allocation7 + $0xc4] ss:$8 sps:$4 sm:$0xff]   ;;  %v1060_v31 = vld [vmem:[#allocation7 + $0xc0] ss:$8 sps:$4 sm:$0xff]  }
  0x65   :  { %v1061_v32 = vld [vmem:[#allocation7 + $0xd4] ss:$8 sps:$4 sm:$0xff]   ;;  %v1063_v33 = vld [vmem:[#allocation7 + $0xd0] ss:$8 sps:$4 sm:$0xff]   ;;  %v1064_v34 = vld [vmem:[#allocation7 + $0xe4] ss:$8 sps:$4 sm:$0xff]  }
  0x66   :  { %405 = vmatpush1.bf16.msra.mxu1 %v1030_v11  ;;  %v1066_v35 = vld [vmem:[#allocation7 + $0xe0] ss:$8 sps:$4 sm:$0xff]   ;;  %v1067_v36 = vld [vmem:[#allocation7 + $0xf4] ss:$8 sps:$4 sm:$0xff]   ;;  %v1069_v37 = vld [vmem:[#allocation7 + $0xf0] ss:$8 sps:$4 sm:$0xff]  }
  0x67   :  { %406 = vmatprep.subr.bf16.mxu1 %v1031_v12  ;;  %v1070_v38 = vld [vmem:[#allocation8] ss:$8 sps:$4 sm:$0xff]   ;;  %v1072_v39 = vld [vmem:[#allocation8 + $0x4] ss:$8 sps:$4 sm:$0xff]   ;;  %v1075_v40 = vld [vmem:[#allocation8 + $0x14] ss:$8 sps:$4 sm:$0xff]  }
  0x68   :  { %651 = vmatprep.subr.bf16.mxu0 %v1072_v39  ;;  %v1073_v41 = vld [vmem:[#allocation8 + $0x10] ss:$8 sps:$4 sm:$0xff]   ;;  %v1078_v42 = vld [vmem:[#allocation8 + $0x24] ss:$8 sps:$4 sm:$0xff]   ;;  %v1076_v43 = vld [vmem:[#allocation8 + $0x20] ss:$8 sps:$4 sm:$0xff]  }
  0x69   :  { %652 = vmatpush1.bf16.msra.mxu0 %v1070_v38  ;;  %v1081_v44 = vld [vmem:[#allocation8 + $0x34] ss:$8 sps:$4 sm:$0xff]   ;;  %v1079_v45 = vld [vmem:[#allocation8 + $0x30] ss:$8 sps:$4 sm:$0xff]   ;;  %v1084_v46 = vld [vmem:[#allocation8 + $0x44] ss:$8 sps:$4 sm:$0xff]  }
  0x6a   :  { %407 = vmatpush1.bf16.msra.mxu1 %v1033_v13  ;;  %653 = vmatprep.subr.bf16.mxu0 %v1075_v40  ;;  %v1082_v47 = vld [vmem:[#allocation8 + $0x40] ss:$8 sps:$4 sm:$0xff]   ;;  %v1087_v48 = vld [vmem:[#allocation8 + $0x54] ss:$8 sps:$4 sm:$0xff]   ;;  %v1085_v49 = vld [vmem:[#allocation8 + $0x50] ss:$8 sps:$4 sm:$0xff]  }
  0x6b   :  { %408 = vmatprep.subr.bf16.mxu1 %v1034_v14  ;;  %v1090_v50 = vld [vmem:[#allocation8 + $0x64] ss:$8 sps:$4 sm:$0xff]   ;;  %v1088_v51 = vld [vmem:[#allocation8 + $0x60] ss:$8 sps:$4 sm:$0xff]   ;;  %v1093_v52 = vld [vmem:[#allocation8 + $0x74] ss:$8 sps:$4 sm:$0xff]  }
  0x6c   :  { %v1091_v53 = vld [vmem:[#allocation8 + $0x70] ss:$8 sps:$4 sm:$0xff]   ;;  %v1096_v54 = vld [vmem:[#allocation8 + $0x84] ss:$8 sps:$4 sm:$0xff]   ;;  %v1094_v55 = vld [vmem:[#allocation8 + $0x80] ss:$8 sps:$4 sm:$0xff]  }
  0x6d   :  { %654 = vmatpush1.bf16.msra.mxu0 %v1073_v41  ;;  %v1099_v56 = vld [vmem:[#allocation8 + $0x94] ss:$8 sps:$4 sm:$0xff]   ;;  %v1097_v57 = vld [vmem:[#allocation8 + $0x90] ss:$8 sps:$4 sm:$0xff]   ;;  %v1102_v58 = vld [vmem:[#allocation8 + $0xa4] ss:$8 sps:$4 sm:$0xff]  }
  0x6e   :  { %409 = vmatpush1.bf16.msra.mxu1 %v1036_v15  ;;  %655 = vmatprep.subr.bf16.mxu0 %v1078_v42  ;;  %v1100_v59 = vld [vmem:[#allocation8 + $0xa0] ss:$8 sps:$4 sm:$0xff]   ;;  %v1422_v62 = vsub.s32 0, %v111_v61  ;;  %v108_v63 = vld [vmem:[%s1461_s2] sm:$0x3]  ;;  %v1427_v0 = vsub.s32 1, %v111_v61 }
  0x6f   :  { %410 = vmatprep.subr.bf16.mxu1 %v1037_v16  ;;  %v1105_v15 = vld [vmem:[#allocation8 + $0xb4] ss:$8 sps:$4 sm:$0xff]   ;;  %v1103_v16 = vld [vmem:[#allocation8 + $0xb0] ss:$8 sps:$4 sm:$0xff]   ;;  %s1296_s1 = smov [#allocation11]  }
  0x70   :  { %v113_v1 = vrot.slane %v108_v63, %v1422_v62  ;;  %v117_v3 = vrot.slane %v108_v63, %v1427_v0  ;;  %s881_s10 = sshll.u32 %s1296_s1, 4  ;;  %s882_s10 = int_to_ptr.vmem [resolvable:$true] %s881_s10 }
  0x71   :  { %656 = vmatpush1.bf16.msra.mxu0 %v1076_v43  ;;  %s1256_s14 = scalar_lea.vmem %s882_s10, 256  ;;  %p1261_p13 = scmp.lt.s32.totalorder %s882_s10, %s882_s10 }
  0x72   :  { %411 = vmatpush1.bf16.msra.mxu1 %v1039_v17  ;;  %657 = vmatprep.subr.bf16.mxu0 %v1081_v44  ;;  %v1108_v17 = vld [vmem:[#allocation8 + $0xc4] ss:$8 sps:$4 sm:$0xff]   ;;  %p1257_p12 = scmp.ne.s32.totalorder %s882_s10, %s1256_s14  ;;  %p1262_p0 = scmp.lt.s32.totalorder %s1256_s14, %s1256_s14 }
  0x73   :  { %412 = vmatprep.subr.bf16.mxu1 %v1040_v18  ;;  %v1106_v18 = vld [vmem:[#allocation8 + $0xc0] ss:$8 sps:$4 sm:$0xff]  }
  0x74   :  { %p1263_p1 = por %p1262_p0, %p1261_p13 }
  0x75   :  { %658 = vmatpush1.bf16.msra.mxu0 %v1079_v45 }
  0x76   :  { %413 = vmatpush1.bf16.msra.mxu1 %v1042_v19  ;;  %659 = vmatprep.subr.bf16.mxu0 %v1084_v46  ;;  %v1111_v19 = vld [vmem:[#allocation8 + $0xd4] ss:$8 sps:$4 sm:$0xff]   ;;  %p1264_p2 = pnand %p1263_p1, %p1257_p12 }
  0x77   :  { %414 = vmatprep.subr.bf16.mxu1 %v1043_v20  ;;  %v1109_v20 = vld [vmem:[#allocation8 + $0xd0] ss:$8 sps:$4 sm:$0xff]  }
  0x78   :  { %v1124_v46 = vld [vmem:[#allocation10 + $0x58] sm:$0xff]  }
  0x79   :  { %660 = vmatpush1.bf16.msra.mxu0 %v1082_v47  ;;  %v1125_v47 = vld [vmem:[#allocation10 + $0x18] sm:$0xff]  }
  0x7a   :  { %415 = vmatpush1.bf16.msra.mxu1 %v1045_v21  ;;  %661 = vmatprep.subr.bf16.mxu0 %v1087_v48  ;;  %v1114_v21 = vld [vmem:[#allocation8 + $0xe4] ss:$8 sps:$4 sm:$0xff]  }
  0x7b   :  { %416 = vmatprep.subr.bf16.mxu1 %v1046_v22  ;;  %v1112_v22 = vld [vmem:[#allocation8 + $0xe0] ss:$8 sps:$4 sm:$0xff]  }
  0x7c   :  { %v1126_v48 = vld [vmem:[#allocation10 + $0x60] sm:$0xff]  }
  0x7d   :  { %662 = vmatpush1.bf16.msra.mxu0 %v1085_v49  ;;  %v1127_v49 = vld [vmem:[#allocation10 + $0x20] sm:$0xff]  }
  0x7e   :  { %417 = vmatpush1.bf16.msra.mxu1 %v1048_v23  ;;  %663 = vmatprep.subr.bf16.mxu0 %v1090_v50  ;;  %v1117_v23 = vld [vmem:[#allocation8 + $0xf4] ss:$8 sps:$4 sm:$0xff]   ;;  %v1128_v50 = vld [vmem:[#allocation10 + $0x68] sm:$0xff]  }
  0x7f   :  { %418 = vmatprep.subr.bf16.mxu1 %v1049_v24  ;;  %v1115_v24 = vld [vmem:[#allocation8 + $0xf0] ss:$8 sps:$4 sm:$0xff]  }
  0x81   :  { %664 = vmatpush1.bf16.msra.mxu0 %v1088_v51  ;;  %v1129_v51 = vld [vmem:[#allocation10 + $0x28] sm:$0xff]  }
  0x82   :  { %419 = vmatpush1.bf16.msra.mxu1 %v1051_v25  ;;  %665 = vmatprep.subr.bf16.mxu0 %v1093_v52  ;;  %v1118_v25 = vld [vmem:[#allocation10 + $0x40] sm:$0xff]   ;;  %v1130_v52 = vld [vmem:[#allocation10 + $0x70] sm:$0xff]  }
  0x83   :  { %420 = vmatprep.subr.bf16.mxu1 %v1052_v26  ;;  %v1119_v26 = vld [vmem:[#allocation10] sm:$0xff]  }
  0x85   :  { %666 = vmatpush1.bf16.msra.mxu0 %v1091_v53  ;;  %v1131_v53 = vld [vmem:[#allocation10 + $0x30] sm:$0xff]  }
  0x86   :  { %421 = vmatpush1.bf16.msra.mxu1 %v1054_v27  ;;  %667 = vmatprep.subr.bf16.mxu0 %v1096_v54  ;;  %v1120_v27 = vld [vmem:[#allocation10 + $0x48] sm:$0xff]   ;;  %v1132_v54 = vld [vmem:[#allocation10 + $0x78] sm:$0xff]  }
  0x87   :  { %422 = vmatprep.subr.bf16.mxu1 %v1055_v28  ;;  %v1121_v28 = vld [vmem:[#allocation10 + $0x8] sm:$0xff]  }
  0x89   :  { %668 = vmatpush1.bf16.msra.mxu0 %v1094_v55  ;;  %v1133_v55 = vld [vmem:[#allocation10 + $0x38] sm:$0xff]  }
  0x8a   :  { %423 = vmatpush1.bf16.msra.mxu1 %v1057_v29  ;;  %669 = vmatprep.subr.bf16.mxu0 %v1099_v56  ;;  %v1122_v29 = vld [vmem:[#allocation10 + $0x50] sm:$0xff]   ;;  %v479_v56 = vld [vmem:[%s1465_s6] sm:$0x3] }
  0x8b   :  { %424 = vmatprep.subr.bf16.mxu1 %v1058_v30  ;;  %v1123_v30 = vld [vmem:[#allocation10 + $0x10] sm:$0xff]  }
  0x8d   :  { %670 = vmatpush1.bf16.msra.mxu0 %v1097_v57  ;;  %v484_v57 = vrot.slane %v479_v56, %v1422_v62 }
  0x8e   :  { %425 = vmatpush1.bf16.msra.mxu1 %v1060_v31  ;;  %671 = vmatprep.subr.bf16.mxu0 %v1102_v58  ;;  %v228_v31 = vld [vmem:[%s1463_s4] sm:$0x3] }
  0x8f   :  { %426 = vmatprep.subr.bf16.mxu1 %v1061_v32  ;;  %v233_v32 = vrot.slane %v228_v31, %v1422_v62  ;;  %v965_v62 = vld [vmem:[%s1467_s8] ss:$0 sm:$0xff] }
  0x91   :  { %672 = vmatpush1.bf16.msra.mxu0 %v1100_v59  ;;  %v488_v59 = vrot.slane %v479_v56, %v1427_v0 }
  0x92   :  { %427 = vmatpush1.bf16.msra.mxu1 %v1063_v33  ;;  %673 = vmatprep.subr.bf16.mxu0 %v1105_v15 }
  0x93   :  { %428 = vmatprep.subr.bf16.mxu1 %v1064_v34  ;;  %v237_v34 = vrot.slane %v228_v31, %v1427_v0 }
  0x95   :  { %674 = vmatpush1.bf16.msra.mxu0 %v1103_v16 }
  0x96   :  { %429 = vmatpush1.bf16.msra.mxu1 %v1066_v35  ;;  %675 = vmatprep.subr.bf16.mxu0 %v1108_v17 }
  0x97   :  { %430 = vmatprep.subr.bf16.mxu1 %v1067_v36 }
  0x99   :  { %676 = vmatpush1.bf16.msra.mxu0 %v1106_v18 }
  0x9a   :  { %431 = vmatpush1.bf16.msra.mxu1 %v1069_v37  ;;  %677 = vmatprep.subr.bf16.mxu0 %v1111_v19 }
  0x9b   :  { %982 = vmatprep.subr.bf16.mxu1 %v1118_v25 }
  0x9d   :  { %678 = vmatpush1.bf16.msra.mxu0 %v1109_v20 }
  0x9e   :  { %679 = vmatprep.subr.bf16.mxu0 %v1114_v21 }
  0xa1   :  { %680 = vmatpush1.bf16.msra.mxu0 %v1112_v22 }
  0xa2   :  { %681 = vmatprep.subr.bf16.mxu0 %v1117_v23 }
  0xa5   :  { %682 = vmatpush1.bf16.msra.mxu0 %v1115_v24 }
 0x136   :  { %v183_v2 = vpop.f32.mrb[0].mxu0 }
 0x137   :  { %v185_v4 = vpop.f32.mrb[1].mxu0  ;;  %v184_v6 = vadd.f32 %v183_v2, %v113_v1 }
 0x138   :  { %v187_v5 = vpop.f32.mrb[2].mxu0  ;;  %v186_v9 = vadd.f32 %v185_v4, %v117_v3 }
 0x139   :  { %v188_v7 = vadd.f32 %v187_v5, %v113_v1  ;;  %v189_v8 = vpop.f32.mrb[3].mxu0 }
 0x13a   :  { %v190_v10 = vadd.f32 %v189_v8, %v117_v3 }
 0x13b   :  { %v192_v11 = vpack.c.bf16 %v188_v7, %v184_v6 }
 0x13c   :  { %v193_v12 = vpack.c.bf16 %v190_v10, %v186_v9 }
 0x13e   :  { %1134 = vtanh.bf16 %v193_v12 }
 0x13f   :  { %1136 = vtanh.bf16 %v192_v11 }
 0x149   :  { %v1135_v13 = vpop.eup %1134 }
 0x14a   :  { %v1137_v14 = vpop.eup %1136  ;;  %432 = vmatprep.mubr.bf16.mxu1 %v1135_v13 }
 0x14b   :  { %433 = vmatmul.mubr.bf16.vlgmr.msra.gmra.mrb[0].mxu1 %v1137_v14 }
 0x14c   :  { %983 = vmatpush3.bf16.msra.mxu1 %v1119_v26 }
 0x14d   :  { %984 = vmatprep.subr.bf16.mxu1 %v1120_v27 }
 0x150   :  { %985 = vmatpush3.bf16.msra.mxu1 %v1121_v28 }
 0x151   :  { %986 = vmatprep.subr.bf16.mxu1 %v1122_v29 }
 0x154   :  { %987 = vmatpush3.bf16.msra.mxu1 %v1123_v30 }
 0x155   :  { %988 = vmatprep.subr.bf16.mxu1 %v1124_v46 }
 0x158   :  { %989 = vmatpush3.bf16.msra.mxu1 %v1125_v47 }
 0x159   :  { %990 = vmatprep.subr.bf16.mxu1 %v1126_v48 }
 0x15c   :  { %991 = vmatpush3.bf16.msra.mxu1 %v1127_v49 }
 0x15d   :  { %992 = vmatprep.subr.bf16.mxu1 %v1128_v50 }
 0x160   :  { %993 = vmatpush3.bf16.msra.mxu1 %v1129_v51 }
 0x161   :  { %994 = vmatprep.subr.bf16.mxu1 %v1130_v52 }
 0x164   :  { %995 = vmatpush3.bf16.msra.mxu1 %v1131_v53 }
 0x165   :  { %996 = vmatprep.subr.bf16.mxu1 %v1132_v54 }
 0x168   :  { %997 = vmatpush3.bf16.msra.mxu1 %v1133_v55 }
 0x21e   :  { %v434_v33 = vpop.f32.mrb[0].mxu1 }
 0x21f   :  { %v436_v35 = vpop.f32.mrb[1].mxu1  ;;  %v435_v37 = vadd.f32 %v434_v33, %v233_v32 }
 0x220   :  { %v438_v36 = vpop.f32.mrb[2].mxu1  ;;  %v437_v40 = vadd.f32 %v436_v35, %v237_v34 }
 0x221   :  { %v439_v38 = vadd.f32 %v438_v36, %v233_v32  ;;  %v440_v39 = vpop.f32.mrb[3].mxu1 }
 0x222   :  { %v441_v41 = vadd.f32 %v440_v39, %v237_v34 }
 0x223   :  { %v443_v42 = vpack.c.bf16 %v439_v38, %v435_v37 }
 0x224   :  { %v444_v43 = vpack.c.bf16 %v441_v41, %v437_v40 }
 0x226   :  { %1138 = vtanh.bf16 %v444_v43 }
 0x227   :  { %1140 = vtanh.bf16 %v443_v42 }
 0x231   :  { %v1139_v44 = vpop.eup %1138 }
 0x232   :  { %v1141_v45 = vpop.eup %1140  ;;  %683 = vmatprep.mubr.bf16.mxu0 %v1139_v44 }
 0x233   :  { %684 = vmatmul.mubr.bf16.vlgmr.msra.gmra.mrb[4].mxu0 %v1141_v45 }
 0x306   :  { %v685_v58 = vpop.f32.mrb[4].mxu0 }
 0x307   :  { %v687_v60 = vpop.f32.mrb[5].mxu0  ;;  %v686_v63 = vadd.f32 %v685_v58, %v484_v57 }
 0x308   :  { %v689_v61 = vpop.f32.mrb[6].mxu0  ;;  %v688_v3 = vadd.f32 %v687_v60, %v488_v59 }
 0x309   :  { %v690_v1 = vadd.f32 %v689_v61, %v484_v57  ;;  %v691_v2 = vpop.f32.mrb[7].mxu0 }
 0x30a   :  { %v692_v4 = vadd.f32 %v691_v2, %v488_v59 }
 0x30b   :  { %v694_v5 = vpack.c.bf16 %v690_v1, %v686_v63 }
 0x30c   :  { %v695_v6 = vpack.c.bf16 %v692_v4, %v688_v3 }
 0x30e   :  { %1142 = vtanh.bf16 %v695_v6 }
 0x30f   :  { %1144 = vtanh.bf16 %v694_v5 }
 0x319   :  { %v1143_v7 = vpop.eup %1142 }
 0x31a   :  { %v1145_v8 = vpop.eup %1144  ;;  %865 = vmatprep.mubr.bf16.mxu1 %v1143_v7 }
 0x31b   :  { %866 = vmatmul.mubr.bf16.vlgmr.msra.gmra.mrb[4].mxu1 %v1145_v8 }
 0x3ee   :  { %v998_v9 = vpop.f32.mrb[4].mxu1 }
 0x3ef   :  { %v999_v0 = vpop.f32.mrb[5].mxu1 }
 0x3f0   :  { %v1000_v10 = vadd.f32 %v999_v0, %v998_v9  ;;  %v1001_v11 = vpop.f32.mrb[6].mxu1 }
 0x3f1   :  { %v1002_v12 = vpop.f32.mrb[7].mxu1 }
 0x3f2   :  { %v868_v13 = vadd.f32 %v1000_v10, %v965_v62  ;;  %v1003_v14 = vadd.f32 %v1002_v12, %v1001_v11 }
 0x3f4   :  { %874 = vst [vmem:[#allocation11] sm:$0xff] %v868_v13  ;;  %v871_v15 = vadd.f32 %v1003_v14, %v965_v62 }
 0x3f6   :  { %875 = vst [vmem:[#allocation11 + $0x8] sm:$0xff] %v871_v15 }
 0x3f7   :  { %1267 = shalt.err (!%p1264_p2)
}
 0x3f8   :  { %s1268_s16 = scalar_lea.hbm %s1468_s9, 256 }
 0x3f9   :  { %p1269_p3 = scmp.ne.s32.totalorder %s1468_s9, %s1268_s16  ;;  %p1272_p4 = scmp.lt.u32.totalorder %s1268_s16, %s1468_s9 }
 0x3fb   :  { %p1274_p5 = pnand %p1272_p4, %p1269_p3 }
 0x3fd   :  { %1277 = shalt.err (!%p1274_p5)
}
 0x3fe   :  { %887 = dma.vmem_to_hbm [thread:$0]  %s882_s10, 256, %s1468_s9, [#allocation4], %s1287_s19, %s1287_s19, %s1288_s20  }
 0x3ff   :  { %1284 = dma.done.wait [#allocation4], 256  }
 0x400   :  { %1285 = vsyncadd [#allocation4], 4294967040 }
 0x401   :  { %891 = vsyncpa [#allocation3], 1 }
 0x402   :  { %892 = vsyncpa [#allocation6], 1 }
 0x403   :  { %893 = vsyncpa [#allocation9], 1 }
 0x404   :  { %894 = vsyncpa [#allocation4], 1 }

</bundles_post_ra>
